<compile_context>
chip_gen: v5e
topology: v5e:2x2
jax: 0.10.0
libtpu: 0.0.40
codegen_flags: <defaults>
</compile_context>

<pallas_src>
import math
import functools

import jax
import jax.numpy as jnp
from jax import lax
from jax.experimental import pallas as pl
from jax.experimental.pallas import tpu as pltpu

LANE = 128


def _softplus(x):
    # numerically-stable softplus, matches F.softplus semantics
    return jnp.maximum(x, 0.0) + jnp.log1p(jnp.exp(-jnp.abs(x)))


def policy_kernel(slab_ref, w1_ref, b1_ref, wa_ref, ba_ref, wh_ref, bh_ref,
                  out_ref, *, action_dim):
    A = action_dim
    TB, W = out_ref.shape                       # W == 128-lane slab width

    slab = slab_ref[...]                        # (TB, W) f32: [ eps | x | 0 ]

    # ---- MXU chain (bf16 operands, f32 accumulation) -------------------------------------
    # fc1 + ReLU.  w1 is zero-row-padded to (W, H) so eps/pad lanes contribute nothing.
    h = jnp.dot(slab.astype(jnp.bfloat16), w1_ref[...],
                preferred_element_type=jnp.float32) + b1_ref[...]
    h = jnp.maximum(h, 0.0)                                                     # (TB, H)

    # MultiheadAttention with seq_len==1, folded offline: attn = h @ (Wv@Wo) + (bv@Wo + bo)
    attn = jnp.dot(h.astype(jnp.bfloat16), wa_ref[...],
                   preferred_element_type=jnp.float32) + ba_ref[...]            # (TB, H)

    # fused, lane-aligned heads: mu in lanes [0, W), pre_std in lanes [W, 2W)
    heads = jnp.dot(attn.astype(jnp.bfloat16), wh_ref[...],
                    preferred_element_type=jnp.float32) + bh_ref[...]           # (TB, 2W)

    # ---- f32 VPU/EUP tail -----------------------------------------------------------------
    mu = heads[:, :W]                           # lane-aligned slice (free)
    pre_std = heads[:, W:]                      # lane-aligned slice (free)
    std = _softplus(pre_std)                    # pad lanes: softplus(0) -> finite, masked later

    # eps occupies lanes [0, A) of the slab; lanes >= A (x / padding) are masked out below.
    eps = slab
    sample = mu + std * eps                     # rsample() == mu + std * eps

    # Normal(mu, std).log_prob(sample) with (sample - mu)^2 / (2 var) == 0.5 * eps^2
    log_prob = -0.5 * (eps * eps) - jnp.log(std) - 0.5 * math.log(2.0 * math.pi)

    action = jnp.tanh(sample)
    # PyTorch quirk reproduced exactly: tanh applied to the already-tanh'ed action.
    log_prob = log_prob - jnp.log(1.0 - jnp.tanh(action) ** 2 + 1e-07)

    lane = lax.broadcasted_iota(jnp.int32, (TB, W), 1)
    act_mask = lane < A                         # mask pad lanes out of the reduction
    logp = jnp.sum(jnp.where(act_mask, log_prob, 0.0), axis=-1, keepdims=True)  # (TB, 1)

    # single lane-dense output slab [ action | logp | 0 ], built with selects (no concat)
    out_ref[...] = jnp.where(act_mask, action, jnp.where(lane == A, logp, 0.0))


def policy_net_continuous(x, eps, params, *, block_b=None):
    """Returns (action, log_prob) exactly like the PyTorch module's forward.

    eps is the standard-normal reparameterization noise (drawn outside the kernel so the
    call stays a pure function of its inputs).
    """
    B, S = x.shape
    A = eps.shape[-1]
    W = params["w1p"].shape[0]                  # packed slab / output lane width (128-mult)
    H = params["w1p"].shape[1]
    assert params["w_head"].shape[1] == 2 * W
    assert S + A <= W and A + 1 <= W

    # pack [ eps | x | 0 ] into one lane-dense f32 slab (one input DMA stream instead of two)
    slab = jnp.concatenate([eps.astype(jnp.float32), x.astype(jnp.float32)], axis=-1)
    slab = jnp.pad(slab, ((0, 0), (0, W - (S + A))))

    # batch tile: large tiles amortize per-grid-step overhead and fill the MXU M-dimension
    if block_b is None:
        block_b = 1024
    TB = min(block_b, B)
    if TB != B:
        TB = max(8, (TB // 8) * 8)
    grid = (pl.cdiv(B, TB),)

    out_shape = jax.ShapeDtypeStruct((B, W), jnp.float32)

    # rough cost hint so XLA schedules this tiny custom call sensibly inside a larger step
    flops = 2 * B * (W * H + H * H + H * 2 * W) + 30 * B * W
    transcendentals = B * 6 * W
    bytes_accessed = (4 * (slab.size + B * W)
                      + 2 * (params["w1p"].size + params["w_attn"].size + params["w_head"].size)
                      + 4 * (params["b1"].size + params["b_attn"].size + params["b_head"].size))
    ce = pl.CostEstimate(flops=flops, transcendentals=transcendentals,
                         bytes_accessed=bytes_accessed)

    full = lambda shape: pl.BlockSpec(shape, lambda i: (0, 0))

    out = pl.pallas_call(
        functools.partial(policy_kernel, action_dim=A),
        out_shape=out_shape,
        grid=grid,
        in_specs=[
            pl.BlockSpec((TB, W), lambda i: (i, 0)),   # [eps | x | 0] slab
            full((W, H)),                              # w1 (zero-padded rows), bf16
            full((1, H)),                              # b1, f32
            full((H, H)),                              # folded attention weight, bf16
            full((1, H)),                              # folded attention bias, f32
            full((H, 2 * W)),                          # lane-aligned mu/std heads, bf16
            full((1, 2 * W)),                          # heads bias, f32
        ],
        out_specs=pl.BlockSpec((TB, W), lambda i: (i, 0)),
        compiler_params=pltpu.CompilerParams(
            dimension_semantics=("parallel",),
            vmem_limit_bytes=32 * 1024 * 1024),
        cost_estimate=ce,
    )(slab,
      params["w1p"], params["b1"],
      params["w_attn"], params["b_attn"],
      params["w_head"], params["b_head"])

    action = out[:, :A]
    log_prob = out[:, A:A + 1]
    return action, log_prob


def prepare_params(raw, *, action_dim):
    """Fold the seq_len==1 attention, fuse + lane-align the mu/std heads, pad fc1 for the
    packed [eps | x | 0] input slab, and store matmul weights in bf16 (f32 biases).
    All exact linear algebra, done once offline."""
    S, H = raw["w1"].shape
    A = action_dim
    W = LANE * pl.cdiv(max(S + A, A + 1), LANE)

    # fc1 weight padded to the slab layout: rows [A, A+S) = w1, eps/pad rows = 0
    w1p = jnp.zeros((W, H), jnp.float32).at[A:A + S, :].set(raw["w1"])

    # seq_len==1 attention collapses to one linear: Wv @ Wo
    w_attn = jnp.dot(raw["wv"], raw["wo"])                    # (H, H)
    b_attn = jnp.dot(raw["bv"], raw["wo"]) + raw["bo"]        # (1, H)

    # lane-aligned fused heads: mu -> lanes [0, A), pre_std -> lanes [W, W+A)
    w_head = jnp.zeros((H, 2 * W), jnp.float32)
    w_head = w_head.at[:, :A].set(raw["wmu"]).at[:, W:W + A].set(raw["wstd"])
    b_head = jnp.zeros((1, 2 * W), jnp.float32)
    b_head = b_head.at[:, :A].set(raw["bmu"]).at[:, W:W + A].set(raw["bstd"])

    return dict(w1p=w1p.astype(jnp.bfloat16), b1=raw["b1"].astype(jnp.float32),
                w_attn=w_attn.astype(jnp.bfloat16), b_attn=b_attn.astype(jnp.float32),
                w_head=w_head.astype(jnp.bfloat16), b_head=b_head.astype(jnp.float32))


def init_raw_params(key, state_dim, hidden_dim, action_dim):
    """Deterministic synthetic parameters (PyTorch-style uniform fan-in init)."""
    ks = jax.random.split(key, 10)

    def uniform(k, shape, fan_in):
        bound = 1.0 / math.sqrt(fan_in)
        return jax.random.uniform(k, shape, jnp.float32, -bound, bound)

    # fc1: (hidden, state) in torch -> stored transposed (state, hidden)
    w1 = uniform(ks[0], (state_dim, hidden_dim), state_dim)
    b1 = uniform(ks[1], (1, hidden_dim), state_dim)

    # attention in_proj: (3H, H) in torch; only the V slice matters for seq_len == 1
    w_in = uniform(ks[2], (3 * hidden_dim, hidden_dim), hidden_dim)
    b_in = uniform(ks[3], (1, 3 * hidden_dim), hidden_dim)
    wv = jnp.transpose(w_in[2 * hidden_dim:3 * hidden_dim, :])          # (H, H)
    bv = b_in[:, 2 * hidden_dim:3 * hidden_dim]                         # (1, H)

    # attention out_proj
    wo = jnp.transpose(uniform(ks[4], (hidden_dim, hidden_dim), hidden_dim))
    bo = uniform(ks[5], (1, hidden_dim), hidden_dim)

    # fc_mu / fc_std: (action, hidden) in torch -> transposed (hidden, action)
    wmu = uniform(ks[6], (hidden_dim, action_dim), hidden_dim)
    bmu = uniform(ks[7], (1, action_dim), hidden_dim)
    wstd = uniform(ks[8], (hidden_dim, action_dim), hidden_dim)
    bstd = uniform(ks[9], (1, action_dim), hidden_dim)

    return dict(w1=w1, b1=b1, wv=wv, bv=bv, wo=wo, bo=bo,
                wmu=wmu, bmu=bmu, wstd=wstd, bstd=bstd)


def reference_forward(x, eps, raw):
    """Pure-JAX f32 reference of the PyTorch forward (for a loose sanity check)."""
    h = jnp.maximum(jnp.dot(x, raw["w1"]) + raw["b1"], 0.0)
    attn = jnp.dot(jnp.dot(h, raw["wv"]), raw["wo"]) + jnp.dot(raw["bv"], raw["wo"]) + raw["bo"]
    mu = jnp.dot(attn, raw["wmu"]) + raw["bmu"]
    std = jax.nn.softplus(jnp.dot(attn, raw["wstd"]) + raw["bstd"])
    sample = mu + std * eps
    log_prob = (-((sample - mu) ** 2) / (2.0 * std ** 2)
                - jnp.log(std) - 0.5 * math.log(2.0 * math.pi))
    action = jnp.tanh(sample)
    log_prob = log_prob - jnp.log(1.0 - jnp.tanh(action) ** 2 + 1e-07)
    return action, jnp.sum(log_prob, axis=-1, keepdims=True)


if __name__ == "__main__":
    # small shapes consistent with the module:
    #   batch=8, state_dim=32, hidden_dim=128 (4 heads -> head_dim=32), action_dim=8
    B, STATE, HIDDEN, ACTION = 8, 32, 128, 8

    key = jax.random.PRNGKey(0)
    k_x, k_eps, k_p = jax.random.split(key, 3)

    x = jax.random.normal(k_x, (B, STATE), jnp.float32)
    # TODO(synk): Normal.rsample's noise is drawn outside the kernel so the kernel stays a
    # pure function (an in-kernel pltpu.prng_* variant would not match jax.random bit-exactly).
    eps = jax.random.normal(k_eps, (B, ACTION), jnp.float32)

    raw = init_raw_params(k_p, STATE, HIDDEN, ACTION)
    params = prepare_params(raw, action_dim=ACTION)

    fwd = jax.jit(policy_net_continuous)
    action, log_prob = fwd(x, eps, params)
    jax.block_until_ready((action, log_prob))

    assert action.shape == (B, ACTION)
    assert log_prob.shape == (B, 1)
    assert bool(jnp.all(jnp.isfinite(action))) and bool(jnp.all(jnp.isfinite(log_prob)))
    assert bool(jnp.all(jnp.abs(action) <= 1.0))

    # loose tolerance: kernel uses bf16 MXU operands (f32 accumulate / f32 tail) by design
    a_ref, lp_ref = reference_forward(x, eps, raw)
    assert bool(jnp.all(jnp.abs(action - a_ref) < 5e-2))
    assert bool(jnp.all(jnp.abs(log_prob - lp_ref) < 1.0))

    print("KERNEL_OK")
</pallas_src>

<mosaic_0001>
module attributes {stable_mosaic.version = 11 : i64} {
  func.func @policy_kernel(%arg0: i32, %arg1: memref<8x128xf32, #tpu.memory_space<vmem>>, %arg2: memref<128x128xbf16, #tpu.memory_space<vmem>>, %arg3: memref<1x128xf32, #tpu.memory_space<vmem>>, %arg4: memref<128x128xbf16, #tpu.memory_space<vmem>>, %arg5: memref<1x128xf32, #tpu.memory_space<vmem>>, %arg6: memref<128x256xbf16, #tpu.memory_space<vmem>>, %arg7: memref<1x256xf32, #tpu.memory_space<vmem>>, %arg8: memref<8x128xf32, #tpu.memory_space<vmem>>) attributes {dimension_semantics = [#tpu.dimension_semantics<parallel>], iteration_bounds = array<i64: 1>, scalar_prefetch = 0 : i64, scratch_operands = 0 : i64, tpu.core_type = #tpu.core_type<tc>, window_params = [{transform_indices = @transform_0, window_bounds = array<i64: 8, 128>}, {pipeline_mode = #tpu.pipeline_mode<synchronous>, transform_indices = @transform_1, window_bounds = array<i64: 128, 128>}, {pipeline_mode = #tpu.pipeline_mode<synchronous>, transform_indices = @transform_2, window_bounds = array<i64: 1, 128>}, {pipeline_mode = #tpu.pipeline_mode<synchronous>, transform_indices = @transform_3, window_bounds = array<i64: 128, 128>}, {pipeline_mode = #tpu.pipeline_mode<synchronous>, transform_indices = @transform_4, window_bounds = array<i64: 1, 128>}, {pipeline_mode = #tpu.pipeline_mode<synchronous>, transform_indices = @transform_5, window_bounds = array<i64: 128, 256>}, {pipeline_mode = #tpu.pipeline_mode<synchronous>, transform_indices = @transform_6, window_bounds = array<i64: 1, 256>}, {transform_indices = @transform_7, window_bounds = array<i64: 8, 128>}]} {
    %c0 = arith.constant 0 : index
    %c0_0 = arith.constant 0 : index
    %0 = vector.load %arg1[%c0, %c0_0] : memref<8x128xf32, #tpu.memory_space<vmem>>, vector<8x128xf32>
    %1 = arith.truncf %0 : vector<8x128xf32> to vector<8x128xbf16>
    %c0_1 = arith.constant 0 : index
    %c0_2 = arith.constant 0 : index
    %2 = vector.load %arg2[%c0_1, %c0_2] : memref<128x128xbf16, #tpu.memory_space<vmem>>, vector<128x128xbf16>
    %cst = arith.constant dense<0.000000e+00> : vector<8x128xf32>
    %3 = tpu.matmul %1, %2, %cst {dimension_numbers = #tpu.dot_dimension_numbers<[1], [0], [0], [1], [0, 0, 1, 1], [], []>} : vector<8x128xbf16>, vector<128x128xbf16>, vector<8x128xf32> -> vector<8x128xf32>
    %c0_3 = arith.constant 0 : index
    %c0_4 = arith.constant 0 : index
    %4 = vector.load %arg3[%c0_3, %c0_4] : memref<1x128xf32, #tpu.memory_space<vmem>>, vector<1x128xf32>
    %5 = vector.broadcast %4 : vector<1x128xf32> to vector<8x128xf32>
    %6 = arith.addf %3, %5 : vector<8x128xf32>
    %cst_5 = arith.constant 0.000000e+00 : f32
    %7 = vector.broadcast %cst_5 : f32 to vector<8x128xf32>
    %8 = arith.maximumf %6, %7 : vector<8x128xf32>
    %9 = arith.truncf %8 : vector<8x128xf32> to vector<8x128xbf16>
    %c0_6 = arith.constant 0 : index
    %c0_7 = arith.constant 0 : index
    %10 = vector.load %arg4[%c0_6, %c0_7] : memref<128x128xbf16, #tpu.memory_space<vmem>>, vector<128x128xbf16>
    %cst_8 = arith.constant dense<0.000000e+00> : vector<8x128xf32>
    %11 = tpu.matmul %9, %10, %cst_8 {dimension_numbers = #tpu.dot_dimension_numbers<[1], [0], [0], [1], [0, 0, 1, 1], [], []>} : vector<8x128xbf16>, vector<128x128xbf16>, vector<8x128xf32> -> vector<8x128xf32>
    %c0_9 = arith.constant 0 : index
    %c0_10 = arith.constant 0 : index
    %12 = vector.load %arg5[%c0_9, %c0_10] : memref<1x128xf32, #tpu.memory_space<vmem>>, vector<1x128xf32>
    %13 = vector.broadcast %12 : vector<1x128xf32> to vector<8x128xf32>
    %14 = arith.addf %11, %13 : vector<8x128xf32>
    %15 = arith.truncf %14 : vector<8x128xf32> to vector<8x128xbf16>
    %c0_11 = arith.constant 0 : index
    %c0_12 = arith.constant 0 : index
    %16 = vector.load %arg6[%c0_11, %c0_12] : memref<128x256xbf16, #tpu.memory_space<vmem>>, vector<128x256xbf16>
    %cst_13 = arith.constant dense<0.000000e+00> : vector<8x256xf32>
    %17 = tpu.matmul %15, %16, %cst_13 {dimension_numbers = #tpu.dot_dimension_numbers<[1], [0], [0], [1], [0, 0, 1, 1], [], []>} : vector<8x128xbf16>, vector<128x256xbf16>, vector<8x256xf32> -> vector<8x256xf32>
    %c0_14 = arith.constant 0 : index
    %c0_15 = arith.constant 0 : index
    %18 = vector.load %arg7[%c0_14, %c0_15] : memref<1x256xf32, #tpu.memory_space<vmem>>, vector<1x256xf32>
    %19 = vector.broadcast %18 : vector<1x256xf32> to vector<8x256xf32>
    %20 = arith.addf %17, %19 : vector<8x256xf32>
    %21 = vector.extract_strided_slice %20 {offsets = [0, 0], sizes = [8, 128], strides = [1, 1]} : vector<8x256xf32> to vector<8x128xf32>
    %22 = vector.extract_strided_slice %20 {offsets = [0, 128], sizes = [8, 128], strides = [1, 1]} : vector<8x256xf32> to vector<8x128xf32>
    %cst_16 = arith.constant 0.000000e+00 : f32
    %23 = vector.broadcast %cst_16 : f32 to vector<8x128xf32>
    %24 = arith.maximumf %22, %23 : vector<8x128xf32>
    %25 = math.absf %22 : vector<8x128xf32>
    %cst_17 = arith.constant 0.000000e+00 : f32
    %26 = vector.broadcast %cst_17 : f32 to vector<8x128xf32>
    %27 = arith.subf %26, %25 : vector<8x128xf32>
    %28 = math.exp %27 : vector<8x128xf32>
    %29 = math.log1p %28 : vector<8x128xf32>
    %30 = arith.addf %24, %29 : vector<8x128xf32>
    %31 = arith.mulf %30, %0 : vector<8x128xf32>
    %32 = arith.addf %21, %31 : vector<8x128xf32>
    %33 = arith.mulf %0, %0 : vector<8x128xf32>
    %cst_18 = arith.constant -5.000000e-01 : f32
    %34 = vector.broadcast %cst_18 : f32 to vector<8x128xf32>
    %35 = arith.mulf %34, %33 : vector<8x128xf32>
    %36 = math.log %30 : vector<8x128xf32>
    %37 = arith.subf %35, %36 : vector<8x128xf32>
    %cst_19 = arith.constant 0.918938517 : f32
    %38 = vector.broadcast %cst_19 : f32 to vector<8x128xf32>
    %39 = arith.subf %37, %38 : vector<8x128xf32>
    %40 = math.tanh %32 : vector<8x128xf32>
    %41 = math.tanh %40 : vector<8x128xf32>
    %42 = arith.mulf %41, %41 : vector<8x128xf32>
    %cst_20 = arith.constant 1.000000e+00 : f32
    %43 = vector.broadcast %cst_20 : f32 to vector<8x128xf32>
    %44 = arith.subf %43, %42 : vector<8x128xf32>
    %cst_21 = arith.constant 1.000000e-07 : f32
    %45 = vector.broadcast %cst_21 : f32 to vector<8x128xf32>
    %46 = arith.addf %44, %45 : vector<8x128xf32>
    %47 = math.log %46 : vector<8x128xf32>
    %48 = arith.subf %39, %47 : vector<8x128xf32>
    %49 = tpu.iota {dimensions = array<i32: 1>} : vector<8x128xi32>
    %c8_i32 = arith.constant 8 : i32
    %50 = vector.broadcast %c8_i32 : i32 to vector<8x128xi32>
    %51 = arith.cmpi slt, %49, %50 : vector<8x128xi32>
    %cst_22 = arith.constant 0.000000e+00 : f32
    %52 = vector.broadcast %cst_22 : f32 to vector<8x128xf32>
    %53 = arith.select %51, %48, %52 : vector<8x128xi1>, vector<8x128xf32>
    %cst_23 = arith.constant dense<0.000000e+00> : vector<8xf32>
    %54 = vector.multi_reduction <add>, %53, %cst_23 [1] : vector<8x128xf32> to vector<8xf32>
    %55 = vector.shape_cast %54 : vector<8xf32> to vector<8x1xf32>
    %c8_i32_24 = arith.constant 8 : i32
    %56 = vector.broadcast %c8_i32_24 : i32 to vector<8x128xi32>
    %57 = arith.cmpi eq, %49, %56 : vector<8x128xi32>
    %cst_25 = arith.constant 0.000000e+00 : f32
    %58 = vector.shape_cast %55 : vector<8x1xf32> to vector<8x1xf32>
    %59 = vector.broadcast %58 : vector<8x1xf32> to vector<8x128xf32>
    %60 = vector.broadcast %cst_25 : f32 to vector<8x128xf32>
    %61 = arith.select %57, %59, %60 : vector<8x128xi1>, vector<8x128xf32>
    %62 = arith.select %51, %40, %61 : vector<8x128xi1>, vector<8x128xf32>
    %c0_26 = arith.constant 0 : index
    %c0_27 = arith.constant 0 : index
    %63 = vector.load %arg8[%c0_26, %c0_27] : memref<8x128xf32, #tpu.memory_space<vmem>>, vector<8x128xf32>
    tpu.vector_store %arg8[%c0_26, %c0_27], %62 {strides = array<i32>} : memref<8x128xf32, #tpu.memory_space<vmem>>, vector<8x128xf32>,
    return
  }
  func.func @transform_0(%arg0: i32) -> (i32, i32) {
    %c0_i32 = arith.constant 0 : i32
    %c0_i32_0 = arith.constant 0 : i32
    return %arg0, %c0_i32 : i32, i32
  }
  func.func @transform_1(%arg0: i32) -> (i32, i32) {
    %c0_i32 = arith.constant 0 : i32
    %c0_i32_0 = arith.constant 0 : i32
    %c0_i32_1 = arith.constant 0 : i32
    return %c0_i32, %c0_i32_0 : i32, i32
  }
  func.func @transform_2(%arg0: i32) -> (i32, i32) {
    %c0_i32 = arith.constant 0 : i32
    %c0_i32_0 = arith.constant 0 : i32
    %c0_i32_1 = arith.constant 0 : i32
    return %c0_i32, %c0_i32_0 : i32, i32
  }
  func.func @transform_3(%arg0: i32) -> (i32, i32) {
    %c0_i32 = arith.constant 0 : i32
    %c0_i32_0 = arith.constant 0 : i32
    %c0_i32_1 = arith.constant 0 : i32
    return %c0_i32, %c0_i32_0 : i32, i32
  }
  func.func @transform_4(%arg0: i32) -> (i32, i32) {
    %c0_i32 = arith.constant 0 : i32
    %c0_i32_0 = arith.constant 0 : i32
    %c0_i32_1 = arith.constant 0 : i32
    return %c0_i32, %c0_i32_0 : i32, i32
  }
  func.func @transform_5(%arg0: i32) -> (i32, i32) {
    %c0_i32 = arith.constant 0 : i32
    %c0_i32_0 = arith.constant 0 : i32
    %c0_i32_1 = arith.constant 0 : i32
    return %c0_i32, %c0_i32_0 : i32, i32
  }
  func.func @transform_6(%arg0: i32) -> (i32, i32) {
    %c0_i32 = arith.constant 0 : i32
    %c0_i32_0 = arith.constant 0 : i32
    %c0_i32_1 = arith.constant 0 : i32
    return %c0_i32, %c0_i32_0 : i32, i32
  }
  func.func @transform_7(%arg0: i32) -> (i32, i32) {
    %c0_i32 = arith.constant 0 : i32
    %c0_i32_0 = arith.constant 0 : i32
    return %arg0, %c0_i32 : i32, i32
  }
}

</mosaic_0001>

<bundles_post_ra>
// kernel: policy_net_continuous.1
= control target key start
LH: loop header
LB: loop body
LE: loop exit
PB: predicated region body
PF: predicated region fallthrough
CT: control target
= control target key end

     0   :  { %12 = vsyncpa [#allocation3], 0  ;;  %s751_s0 = inlined_call_operand.vmem [shape: f32[8,128], index: 0, kind: input, shape index: {}]   ;;  %s752_s1 = inlined_call_operand.hbm [shape: bf16[128,128], index: 1, kind: input, shape index: {}]   ;;  %s753_s2 = inlined_call_operand.vmem [shape: f32[1,128], index: 2, kind: input, shape index: {}]   ;;  %s754_s3 = inlined_call_operand.hbm [shape: bf16[128,128], index: 3, kind: input, shape index: {}]   ;;  %s755_s4 = inlined_call_operand.vmem [shape: f32[1,128], index: 4, kind: input, shape index: {}]   ;;  %s756_s5 = inlined_call_operand.hbm [shape: bf16[128,256], index: 5, kind: input, shape index: {}]   ;;  %s757_s6 = inlined_call_operand.vmem [shape: f32[1,256], index: 6, kind: input, shape index: {}]   ;;  %s758_s7 = inlined_call_operand.vmem [shape: f32[8,128], index: 7, kind: output, shape index: {}]  }
   0x1   :  { %13 = vsyncpa [#allocation5], 0  ;;  %s35_s26 = sshll.u32 %s754_s3, 4  ;;  %s673_s27 = smov [#allocation4]   ;;  %s36_s26 = int_to_ptr.hbm [resolvable:$true] %s35_s26 }
   0x2   :  { %s37_s28 = sshll.u32 %s673_s27, 4  ;;  %s20_s8 = sshll.u32 %s752_s1, 4  ;;  %s38_s28 = int_to_ptr.vmem [resolvable:$true] %s37_s28  ;;  %s21_s8 = int_to_ptr.hbm [resolvable:$true] %s20_s8 }
   0x3   :  { %s674_s9 = smov 64   ;;  %s675_s10 = smov 4  }
   0x4   :  { %43 = dma.hbm_to_vmem [thread:$0]  %s36_s26, 1024, %s38_s28, [#allocation5], %s674_s9, %s674_s9, %s675_s10  }
   0x5   :  { %s676_s11 = smov [#allocation2]   ;;  %s50_s15 = sshll.u32 %s756_s5, 4  ;;  %s51_s15 = int_to_ptr.hbm [resolvable:$true] %s50_s15 }
   0x6   :  { %s22_s12 = sshll.u32 %s676_s11, 4  ;;  %s677_s3 = smov [#allocation6]   ;;  %s23_s12 = int_to_ptr.vmem [resolvable:$true] %s22_s12 }
   0x7   :  { %28 = dma.hbm_to_vmem [thread:$0]  %s21_s8, 1024, %s23_s12, [#allocation3], %s674_s9, %s674_s9, %s675_s10  }
   0x8   :  { %s52_s16 = sshll.u32 %s677_s3, 4  ;;  %s678_s17 = smov 128   ;;  %s53_s16 = int_to_ptr.vmem [resolvable:$true] %s52_s16 }
   0x9   :  { %s679_s18 = smov 8  }
   0xa   :  { %58 = dma.hbm_to_vmem [thread:$0]  %s51_s15, 2048, %s53_s16, [#allocation5], %s678_s17, %s678_s17, %s679_s18  }
   0xb   :  { %669 = dma.done.wait [#allocation3], 1024  }
   0xc   :  { %670 = vsyncadd [#allocation3], 4294966272 }
   0xd   :  { %671 = dma.done.wait [#allocation5], 3072  }
   0xe   :  { %672 = vsyncadd [#allocation5], 4294964224  ;;  %v551_v0 = vld [vmem:[#allocation2 + $0x38] sm:$0xff]  ;;  %v550_v1 = vld [vmem:[#allocation2 + $0x30] sm:$0xff] }
   0xf   :  { %143 = vmatpush.bf16.msra.mxu0 %v551_v0  ;;  %v559_v2 = vld [vmem:[#allocation4 + $0x38] sm:$0xff]  ;;  %v558_v3 = vld [vmem:[#allocation4 + $0x30] sm:$0xff]  ;;  %v549_v4 = vld [vmem:[#allocation2 + $0x28] sm:$0xff] }
  0x10   :  { %226 = vmatpush.bf16.msra.mxu1 %v559_v2  ;;  %v557_v5 = vld [vmem:[#allocation4 + $0x28] sm:$0xff]  ;;  %v548_v6 = vld [vmem:[#allocation2 + $0x20] sm:$0xff]  ;;  %v547_v8 = vld [vmem:[#allocation2 + $0x18] sm:$0xff] }
  0x11   :  { %v556_v7 = vld [vmem:[#allocation4 + $0x20] sm:$0xff]  ;;  %v555_v9 = vld [vmem:[#allocation4 + $0x18] sm:$0xff]  ;;  %v546_v10 = vld [vmem:[#allocation2 + $0x10] sm:$0xff] }
  0x12   :  { %v554_v11 = vld [vmem:[#allocation4 + $0x10] sm:$0xff]  ;;  %v545_v12 = vld [vmem:[#allocation2 + $0x8] sm:$0xff]  ;;  %v544_v13 = vld [vmem:[#allocation2] sm:$0xff] }
  0x13   :  { %144 = vmatpush.bf16.msra.mxu0 %v550_v1  ;;  %v732_v14 = vld [vmem:[%s751_s0] sm:$0xff]  ;;  %v553_v16 = vld [vmem:[#allocation4 + $0x8] sm:$0xff]  ;;  %v537_v18 = vld [vmem:[#allocation6 + $0x70] sm:$0xf] }
  0x14   :  { %227 = vmatpush.bf16.msra.mxu1 %v558_v3  ;;  %v74_v15 = vpack.c.bf16 %v732_v14, %v732_v14  ;;  %v552_v17 = vld [vmem:[#allocation4] sm:$0xff]  ;;  %v575_v19 = vld [vmem:[#allocation6 + $0x74] sm:$0xf0]  ;;  %v574_v20 = vld [vmem:[#allocation6 + $0x74] sm:$0xf] }
  0x15   :  { %v538_v21 = vor.u32 %v575_v19, %v537_v18  ;;  %v539_v22 = vld [vmem:[#allocation6 + $0x78] sm:$0xf0]  ;;  %v529_v23 = vld [vmem:[#allocation6 + $0x60] sm:$0xf]  ;;  %v573_v24 = vld [vmem:[#allocation6 + $0x64] sm:$0xf0] }
  0x16   :  { %v542_v25 = vor.u32 %v574_v20, %v539_v22  ;;  %v572_v26 = vld [vmem:[#allocation6 + $0x64] sm:$0xf]  ;;  %v531_v27 = vld [vmem:[#allocation6 + $0x68] sm:$0xf0]  ;;  %v530_v28 = vor.u32 %v573_v24, %v529_v23  ;;  %v521_v30 = vld [vmem:[#allocation6 + $0x50] sm:$0xf] }
  0x17   :  { %145 = vmatpush.bf16.msra.mxu0 %v549_v4  ;;  %342 = vmatpush.bf16.msra.mxu2 %v538_v21  ;;  %v534_v29 = vor.u32 %v572_v26, %v531_v27  ;;  %v571_v31 = vld [vmem:[#allocation6 + $0x54] sm:$0xf0]  ;;  %v570_v32 = vld [vmem:[#allocation6 + $0x54] sm:$0xf]  ;;  %v523_v33 = vld [vmem:[#allocation6 + $0x58] sm:$0xf0] }
  0x18   :  { %228 = vmatpush.bf16.msra.mxu1 %v557_v5  ;;  %355 = vmatpush.bf16.msra.mxu3 %v542_v25  ;;  %v522_v34 = vor.u32 %v571_v31, %v521_v30  ;;  %v526_v35 = vor.u32 %v570_v32, %v523_v33  ;;  %v513_v36 = vld [vmem:[#allocation6 + $0x40] sm:$0xf]  ;;  %v569_v37 = vld [vmem:[#allocation6 + $0x44] sm:$0xf0]  ;;  %v568_v38 = vld [vmem:[#allocation6 + $0x44] sm:$0xf] }
  0x19   :  { %v515_v39 = vld [vmem:[#allocation6 + $0x48] sm:$0xf0]  ;;  %v514_v40 = vor.u32 %v569_v37, %v513_v36  ;;  %v505_v42 = vld [vmem:[#allocation6 + $0x30] sm:$0xf]  ;;  %v567_v43 = vld [vmem:[#allocation6 + $0x34] sm:$0xf0] }
  0x1a   :  { %v518_v41 = vor.u32 %v568_v38, %v515_v39  ;;  %v566_v44 = vld [vmem:[#allocation6 + $0x34] sm:$0xf]  ;;  %v507_v45 = vld [vmem:[#allocation6 + $0x38] sm:$0xf0]  ;;  %v506_v46 = vor.u32 %v567_v43, %v505_v42  ;;  %v497_v48 = vld [vmem:[#allocation6 + $0x20] sm:$0xf]  ;;  %v385_v42 = vmul.f32 %v732_v14, %v732_v14 }
  0x1b   :  { %146 = vmatpush.bf16.msra.mxu0 %v548_v6  ;;  %343 = vmatpush.bf16.msra.mxu2 %v530_v28  ;;  %v510_v47 = vor.u32 %v566_v44, %v507_v45  ;;  %v565_v49 = vld [vmem:[#allocation6 + $0x24] sm:$0xf0]  ;;  %v564_v50 = vld [vmem:[#allocation6 + $0x24] sm:$0xf]  ;;  %v499_v51 = vld [vmem:[#allocation6 + $0x28] sm:$0xf0] }
  0x1c   :  { %229 = vmatpush.bf16.msra.mxu1 %v556_v7  ;;  %356 = vmatpush.bf16.msra.mxu3 %v534_v29  ;;  %v498_v52 = vor.u32 %v565_v49, %v497_v48  ;;  %v502_v53 = vor.u32 %v564_v50, %v499_v51  ;;  %v489_v54 = vld [vmem:[#allocation6 + $0x10] sm:$0xf]  ;;  %v563_v55 = vld [vmem:[#allocation6 + $0x14] sm:$0xf0]  ;;  %v583_v56 = vld [vmem:[%s753_s2] ss:$0 sm:$0xff]  ;;  %v399_v48 = vlaneseq }
  0x1d   :  { %v562_v57 = vld [vmem:[#allocation6 + $0x14] sm:$0xf]  ;;  %v491_v58 = vld [vmem:[#allocation6 + $0x18] sm:$0xf0]  ;;  %v490_v59 = vor.u32 %v563_v55, %v489_v54  ;;  %v481_v2 = vld [vmem:[#allocation6] sm:$0xf] }
  0x1e   :  { %v494_v61 = vor.u32 %v562_v57, %v491_v58  ;;  %v561_v3 = vld [vmem:[#allocation6 + $0x4] sm:$0xf0]  ;;  %v560_v4 = vld [vmem:[#allocation6 + $0x4] sm:$0xf]  ;;  %v483_v6 = vld [vmem:[#allocation6 + $0x8] sm:$0xf0] }
  0x1f   :  { %147 = vmatpush.bf16.msra.mxu0 %v547_v8  ;;  %344 = vmatpush.bf16.msra.mxu2 %v522_v34  ;;  %v482_v5 = vor.u32 %v561_v3, %v481_v2  ;;  %v486_v7 = vor.u32 %v560_v4, %v483_v6  ;;  %v584_v8 = vld [vmem:[%s755_s4] ss:$0 sm:$0xff]  ;;  %v400_v50 = vand.u32 127, %v399_v48 }
  0x20   :  { %230 = vmatpush.bf16.msra.mxu1 %v555_v9  ;;  %357 = vmatpush.bf16.msra.mxu3 %v526_v35 }
  0x21   :  { %vm401_vm1 = vcmp.lt.s32.totalorder %v400_v50, 8  ;;  %vm405_vm2 = vcmp.eq.s32.totalorder %v400_v50, 8 }
  0x23   :  { %148 = vmatpush.bf16.msra.mxu0 %v546_v10  ;;  %345 = vmatpush.bf16.msra.mxu2 %v514_v40 }
  0x24   :  { %231 = vmatpush.bf16.msra.mxu1 %v554_v11  ;;  %358 = vmatpush.bf16.msra.mxu3 %v518_v41 }
  0x27   :  { %149 = vmatpush.bf16.msra.mxu0 %v545_v12  ;;  %346 = vmatpush.bf16.msra.mxu2 %v506_v46  ;;  %v386_v46 = vmul.f32 -0.5, %v385_v42 }
  0x28   :  { %232 = vmatpush.bf16.msra.mxu1 %v553_v16  ;;  %359 = vmatpush.bf16.msra.mxu3 %v510_v47 }
  0x2b   :  { %150 = vmatpush.bf16.msra.mxu0 %v544_v13  ;;  %347 = vmatpush.bf16.msra.mxu2 %v498_v52  ;;  %v256_v13 = vld [vmem:[%s757_s6] sm:$0x3] }
  0x2c   :  { %233 = vmatpush.bf16.msra.mxu1 %v552_v17  ;;  %360 = vmatpush.bf16.msra.mxu3 %v502_v53  ;;  %v258_v32 = vperm.slane %v256_v13, 0 }
  0x2e   :  { %151 = vmatmul.bf16.vlgmr.msra.gmra.mxu0 %v74_v15  ;;  %v259_v15 = vperm.slane %v256_v13, 1 }
  0x2f   :  { %348 = vmatpush.bf16.msra.mxu2 %v490_v59 }
  0x30   :  { %361 = vmatpush.bf16.msra.mxu3 %v494_v61 }
  0x33   :  { %349 = vmatpush.bf16.msra.mxu2 %v482_v5 }
  0x34   :  { %362 = vmatpush.bf16.msra.mxu3 %v486_v7 }
  0xab   :  { %v152_v60 = vpop.f32.mrf.mxu0 }
  0xac   :  { %v153_v62 = vadd.f32 %v583_v56, %v152_v60 }
  0xae   :  { %v156_v63 = vmax.f32 %v153_v62, 0.0 }
  0xb0   :  { %v157_v0 = vpack.c.bf16 %v156_v63, %v156_v63 }
  0xb2   :  { %234 = vmatmul.bf16.vlgmr.msra.gmra.mxu1 %v157_v0 }
  0xb3   :  { %v154_v1 = vpop.f32.mrf.mxu0 }
 0x12f   :  { %v235_v9 = vpop.f32.mrf.mxu1 }
 0x130   :  { %v236_v10 = vadd.f32 %v584_v8, %v235_v9 }
 0x132   :  { %v239_v11 = vpack.c.bf16 %v236_v10, %v236_v10 }
 0x134   :  { %350 = vmatmul.bf16.vlgmr.msra.gmra.mxu2 %v239_v11  ;;  %363 = vmatmul.bf16.vlgmr.msra.gmra.mxu3 %v239_v11 }
 0x137   :  { %v237_v12 = vpop.f32.mrf.mxu1 }
 0x1b7   :  { %v351_v16 = vpop.f32.mrf.mxu2  ;;  %v364_v17 = vpop.f32.mrf.mxu3 }
 0x1b8   :  { %v365_v18 = vadd.f32 %v364_v17, %v259_v15  ;;  %v352_v36 = vadd.f32 %v351_v16, %v258_v32 }
 0x1ba   :  { %v369_v19 = vand.u32 2147483647, %v365_v18  ;;  %v368_v33 = vmax.f32 %v365_v18, 0.0 }
 0x1bc   :  { %v370_v20 = vsub.f32 0.0, %v369_v19 }
 0x1be   :  { %v371_v21 = vmul.f32 1.442695, %v370_v20 }
 0x1bf   :  { %v353_v22 = vpop.f32.mrf.mxu2  ;;  %v366_v23 = vpop.f32.mrf.mxu3 }
 0x1c0   :  { %585 = vpow2.f32 %v371_v21 }
 0x1c6   :  { %v586_v24 = vpop.eup %585 }
 0x1c7   :  { %v373_v25 = vadd.f32 1.0, %v586_v24  ;;  %v376_v26 = vmul.f32 -0.5, %v586_v24  ;;  %v379_v28 = vand.u32 2147483647, %v586_v24 }
 0x1c9   :  { %587 = vlog2.f32 %v373_v25  ;;  %v377_v27 = vadd.f32 1.0, %v376_v26  ;;  %vm380_vm0 = vcmp.lt.f32.partialorder %v379_v28, 0.0004427343 }
 0x1cb   :  { %v378_v31 = vmul.f32 %v586_v24, %v377_v27 }
 0x1cf   :  { %v588_v29 = vpop.eup %587 }
 0x1d0   :  { %v375_v30 = vmul.f32 0.6931472, %v588_v29 }
 0x1d2   :  { %v381_v34 = vsel %vm380_vm0, %v378_v31, %v375_v30 }
 0x1d3   :  { %v382_v35 = vadd.f32 %v381_v34, %v368_v33 }
 0x1d5   :  { %v383_v37 = vmul.f32 %v382_v35, %v732_v14 }
 0x1d7   :  { %v384_v38 = vadd.f32 %v383_v37, %v352_v36 }
 0x1d9   :  { %589 = vtanh.f32 %v384_v38 }
 0x1df   :  { %v590_v39 = vpop.eup %589 }
 0x1e0   :  { %591 = vtanh.f32 %v590_v39 }
 0x1e1   :  { %593 = vlog2.f32 %v382_v35 }
 0x1e6   :  { %v592_v40 = vpop.eup %591 }
 0x1e7   :  { %v393_v41 = vmul.f32 %v592_v40, %v592_v40  ;;  %v594_v43 = vpop.eup %593 }
 0x1e8   :  { %v388_v47 = vmul.f32 0.6931472, %v594_v43 }
 0x1e9   :  { %v394_v44 = vsub.f32 1.0, %v393_v41 }
 0x1ea   :  { %v389_v49 = vsub.f32 %v386_v46, %v388_v47 }
 0x1eb   :  { %v395_v45 = vadd.f32 1e-07, %v394_v44 }
 0x1ec   :  { %v543_v52 = vadd.f32 -0.9189385, %v389_v49 }
 0x1ed   :  { %595 = vlog2.f32 %v395_v45 }
 0x1f3   :  { %v596_v51 = vpop.eup %595 }
 0x1f4   :  { %v397_v53 = vmul.f32 0.6931472, %v596_v51 }
 0x1f6   :  { %v398_v54 = vsub.f32 %v543_v52, %v397_v53 }
 0x1f8   :  { %v402_v55 = vsel %vm401_vm1, %v398_v54, 0.0 }
 0x1f9   :  { %403 = vadd.xlane.f32.xlu0 %v402_v55 }
 0x26c   :  { %v404_v56 = vpop.xlane.xlu0 %403 }
 0x26d   :  { %v406_v57 = vsel %vm405_vm2, %v404_v56, 0.0 }
 0x26e   :  { %v407_v14 = vsel %vm401_vm1, %v590_v39, %v406_v57 }
 0x26f   :  { %408 = vst [vmem:[%s758_s7] sm:$0xff] %v407_v14 }
 0x270   :  { %413 = vsyncpa [#allocation3], 1 }
 0x271   :  { %414 = vsyncpa [#allocation5], 1 }

</bundles_post_ra>
